<compile_context>
chip_gen: v6e
topology: v6e:2x2x1
jax: 0.10.0
libtpu: 0.0.40
codegen_flags: <defaults>
</compile_context>

<pallas_src>
import functools

import jax
import jax.numpy as jnp
from jax.experimental import pallas as pl
from jax.experimental.pallas import tpu as pltpu

EPS = 1e-5  # PyTorch nn.LayerNorm default

_LANE = 128
_SUBLANE = 8
# Keep the bf16 weight resident in VMEM (single HBM fetch) when it fits this
# budget; footprint accounting below assumes double buffering, so 2x this value
# plus activation blocks still sits well under the 48 MiB VMEM cap.
_WEIGHT_RESIDENT_BYTES = 16 * 1024 * 1024
# 48 MiB is safe headroom on v5e/v6e (128 MiB physical) and v7x (64 MiB).
_VMEM_CAP_BYTES = 48 * 1024 * 1024


def _round_up(n, m):
    return ((n + m - 1) // m) * m


def _prenorm_linear_kernel(x_ref, gamma_ref, beta_ref, w_ref, b_ref, o_ref,
                           y_ref, *, d_actual, d_padded):
    # x_ref:     (tile_rows, D_pad)  input rows (x.dtype)
    # gamma/beta:(1, D_pad) f32      zero-padded beyond d_actual
    # w_ref:     (D_pad, tile_n) bf16
    # b_ref:     (1, tile_n) f32
    # y_ref:     (tile_rows, D_pad) bf16 VMEM scratch (cached LN output)

    # LayerNorm + affine only once per row tile (first N tile); cached for the
    # remaining N tiles of the same row tile.
    @pl.when(pl.program_id(1) == 0)
    def _():
        x = x_ref[...].astype(jnp.float32)
        inv_d = 1.0 / d_actual
        # Padded lanes of x are exactly zero (wrapper pads with zeros), so the
        # plain lane-sum already equals the sum over the real D features.
        mean = jnp.sum(x, axis=-1, keepdims=True) * inv_d
        centered = x - mean
        if d_padded != d_actual:
            # Only the centered value needs masking (padded lanes hold -mean).
            lane = jax.lax.broadcasted_iota(jnp.int32, x.shape, dimension=1)
            centered = jnp.where(lane < d_actual, centered, 0.0)
        var = jnp.sum(centered * centered, axis=-1, keepdims=True) * inv_d
        xn = centered * jax.lax.rsqrt(var + EPS)
        # gamma/beta are zero in padded lanes -> y is zero there -> matmul safe.
        y = xn * gamma_ref[...] + beta_ref[...]
        y_ref[...] = y.astype(y_ref.dtype)

    # fn(x): Linear(dim -> hidden) on the MXU. bf16 operands, f32 accumulate.
    out = jnp.dot(y_ref[...], w_ref[...], preferred_element_type=jnp.float32)
    o_ref[...] = (out + b_ref[...]).astype(o_ref.dtype)


def prepare_params(gamma, beta, w, b, matmul_dtype=jnp.bfloat16):
    """Pad LayerNorm / Linear params to lane-dense shapes and cast the weight.

    Do this once (outside the per-call hot path); the results can be reused
    for every forward call.
    """
    D, H = w.shape
    D_pad = _round_up(D, _LANE)
    H_pad = _round_up(H, _LANE)
    gamma_p = jnp.pad(gamma.astype(jnp.float32), (0, D_pad - D)).reshape(1, D_pad)
    beta_p = jnp.pad(beta.astype(jnp.float32), (0, D_pad - D)).reshape(1, D_pad)
    w_p = jnp.pad(w, ((0, D_pad - D), (0, H_pad - H))).astype(matmul_dtype)
    b_p = jnp.pad(b.astype(jnp.float32), (0, H_pad - H)).reshape(1, H_pad)
    return gamma_p, beta_p, w_p, b_p


@functools.partial(jax.jit,
                   static_argnames=("out_features", "tile_rows", "tile_n"))
def prenorm_linear_prepared(x, gamma_p, beta_p, w_p, b_p, *, out_features,
                            tile_rows=None, tile_n=None):
    """x: (..., D) -> (..., H) with LayerNorm(D) then Linear(D, H)."""
    *lead, D = x.shape
    rows = 1
    for n in lead:
        rows *= n
    H = out_features
    D_pad = gamma_p.shape[1]
    H_pad = w_p.shape[1]

    w_itemsize = jnp.dtype(w_p.dtype).itemsize
    x_itemsize = jnp.dtype(x.dtype).itemsize
    out_itemsize = x_itemsize

    # ---- Tile selection -----------------------------------------------------
    w_bytes = D_pad * H_pad * w_itemsize
    weight_resident = w_bytes <= _WEIGHT_RESIDENT_BYTES

    if tile_n is None:
        if weight_resident:
            tile_n = H_pad                       # weight stays resident in VMEM
        else:
            tile_n = _LANE
            for cand in (512, 384, 256, 128):    # largest divisor of H_pad
                if H_pad % cand == 0:
                    tile_n = cand
                    break
    if H_pad % tile_n != 0:
        raise ValueError(f"tile_n={tile_n} must divide padded H={H_pad}")

    if tile_rows is None:
        # Resident weight: kernel is bound by x-read / out-write -> modest rows
        # (also friendlier to v7x's 64 MiB VMEM).  Streamed weight: bigger row
        # tiles so flops-per-weight-byte saturates the MXU on v5e/v6e.
        tile_rows = 256 if weight_resident else 512
    tile_rows = min(tile_rows, _round_up(rows, _SUBLANE))
    rows_pad = _round_up(rows, tile_rows)

    grid = (rows_pad // tile_rows, H_pad // tile_n)
    grid_i, grid_j = grid

    # ---- Pad x only if needed ------------------------------------------------
    x2 = x.reshape(rows, D)
    if rows_pad != rows or D_pad != D:
        x2 = jnp.pad(x2, ((0, rows_pad - rows), (0, D_pad - D)))

    # ---- VMEM budget (double-buffered blocks + LN scratch) --------------------
    footprint = (2 * tile_rows * D_pad * x_itemsize      # x blocks
                 + 2 * D_pad * tile_n * w_itemsize        # weight blocks
                 + 2 * tile_rows * tile_n * out_itemsize  # output blocks
                 + tile_rows * D_pad * w_itemsize         # y scratch (bf16)
                 + 4 * D_pad * 4 + 4 * tile_n * 4)        # gamma/beta/bias
    vmem_limit = max(int(footprint * 1.5) + (4 << 20), 16 << 20)
    vmem_limit = min(vmem_limit, _VMEM_CAP_BYTES)
    vmem_limit = max(vmem_limit, footprint + (2 << 20))

    # ---- Cost estimate (actual traffic) ---------------------------------------
    w_stream_factor = 1 if grid_j == 1 else grid_i
    cost = pl.CostEstimate(
        flops=2 * rows_pad * D_pad * H_pad + 8 * rows_pad * D_pad,
        transcendentals=rows_pad,                     # one rsqrt per row
        bytes_accessed=(rows_pad * D_pad * x_itemsize
                        + w_stream_factor * D_pad * H_pad * w_itemsize
                        + rows_pad * H_pad * out_itemsize),
    )

    kernel = functools.partial(_prenorm_linear_kernel,
                               d_actual=D, d_padded=D_pad)

    out2 = pl.pallas_call(
        kernel,
        out_shape=jax.ShapeDtypeStruct((rows_pad, H_pad), x.dtype),
        grid_spec=pltpu.PrefetchScalarGridSpec(
            num_scalar_prefetch=0,
            grid=grid,
            in_specs=[
                pl.BlockSpec((tile_rows, D_pad), lambda i, j: (i, 0)),  # x rows
                pl.BlockSpec((1, D_pad), lambda i, j: (0, 0)),          # gamma
                pl.BlockSpec((1, D_pad), lambda i, j: (0, 0)),          # beta
                # Constant block index when grid_j == 1 -> single HBM fetch.
                pl.BlockSpec((D_pad, tile_n), lambda i, j: (0, j)),     # weight
                pl.BlockSpec((1, tile_n), lambda i, j: (0, j)),         # bias
            ],
            out_specs=pl.BlockSpec((tile_rows, tile_n), lambda i, j: (i, j)),
            scratch_shapes=[pltpu.VMEM((tile_rows, D_pad), w_p.dtype)],
        ),
        compiler_params=pltpu.CompilerParams(
            # j must stay on one core so the cached LN scratch is reused across
            # all N tiles of a row tile; i is sharded across cores (megacore).
            dimension_semantics=("parallel", "arbitrary"),
            vmem_limit_bytes=vmem_limit,
        ),
        cost_estimate=cost,
    )(x2, gamma_p, beta_p, w_p, b_p)

    return out2[:rows, :H].reshape(*lead, H)


def prenorm_linear(x, gamma, beta, w, b, **kwargs):
    """Convenience wrapper: pad/cast params then run the fused kernel."""
    params = prepare_params(gamma, beta, w, b)
    return prenorm_linear_prepared(x, *params, out_features=w.shape[1], **kwargs)


def _reference(x, gamma, beta, w, b):
    xf = x.astype(jnp.float32)
    mean = jnp.mean(xf, axis=-1, keepdims=True)
    var = jnp.mean((xf - mean) ** 2, axis=-1, keepdims=True)
    xn = (xf - mean) / jnp.sqrt(var + EPS)
    y = xn * gamma + beta
    return (y @ w.astype(jnp.float32) + b).astype(x.dtype)


if __name__ == "__main__":
    # TODO(synk): PreNorm wraps an arbitrary `fn`; here the canonical
    # Linear(dim -> hidden) is fused. Other fn's need their own kernels.
    batch, seq, dim, hidden = 2, 8, 32, 32

    key = jax.random.PRNGKey(0)
    kx, kw, kb, kg, kbeta = jax.random.split(key, 5)

    x = jax.random.normal(kx, (batch, seq, dim), dtype=jnp.float32)

    # LayerNorm params (exercise the affine path with non-trivial values).
    gamma = 1.0 + 0.1 * jax.random.normal(kg, (dim,), dtype=jnp.float32)
    beta = 0.1 * jax.random.normal(kbeta, (dim,), dtype=jnp.float32)

    # Deterministic params for the wrapped fn = Linear(dim, hidden).
    w = jax.random.normal(kw, (dim, hidden), dtype=jnp.float32) * (1.0 / dim ** 0.5)
    b = jax.random.normal(kb, (hidden,), dtype=jnp.float32) * 0.01

    out = prenorm_linear(x, gamma, beta, w, b)
    out = jax.block_until_ready(out)

    ref = _reference(x, gamma, beta, w, b)
    assert out.shape == (batch, seq, hidden)
    # bf16 MXU operands (f32 accumulate) -> slightly looser tolerance vs f32 ref.
    assert jnp.allclose(out, ref, atol=2e-2, rtol=2e-2), "mismatch vs reference"

    print("KERNEL_OK")
</pallas_src>

<mosaic_0001>
module attributes {stable_mosaic.version = 11 : i64} {
  func.func @_prenorm_linear_kernel(%arg0: i32, %arg1: i32, %arg2: memref<16x128xf32, #tpu.memory_space<vmem>>, %arg3: memref<1x128xf32, #tpu.memory_space<vmem>>, %arg4: memref<1x128xf32, #tpu.memory_space<vmem>>, %arg5: memref<128x128xbf16, #tpu.memory_space<vmem>>, %arg6: memref<1x128xf32, #tpu.memory_space<vmem>>, %arg7: memref<16x128xf32, #tpu.memory_space<vmem>>, %arg8: memref<16x128xbf16, #tpu.memory_space<vmem>>) attributes {dimension_semantics = [#tpu.dimension_semantics<parallel>, #tpu.dimension_semantics<arbitrary>], iteration_bounds = array<i64: 1, 1>, scalar_prefetch = 0 : i64, scratch_operands = 1 : i64, tpu.core_type = #tpu.core_type<tc>, window_params = [{transform_indices = @transform_0, window_bounds = array<i64: 16, 128>}, {pipeline_mode = #tpu.pipeline_mode<synchronous>, transform_indices = @transform_1, window_bounds = array<i64: 1, 128>}, {pipeline_mode = #tpu.pipeline_mode<synchronous>, transform_indices = @transform_2, window_bounds = array<i64: 1, 128>}, {transform_indices = @transform_3, window_bounds = array<i64: 128, 128>}, {transform_indices = @transform_4, window_bounds = array<i64: 1, 128>}, {transform_indices = @transform_5, window_bounds = array<i64: 16, 128>}]} {
    %c0_i32 = arith.constant 0 : i32
    %0 = arith.cmpi eq, %arg1, %c0_i32 : i32
    %1 = arith.extui %0 : i1 to i32
    %c0_i32_0 = arith.constant 0 : i32
    %2 = arith.cmpi ne, %1, %c0_i32_0 : i32
    scf.if %2 {
      %c0_8 = arith.constant 0 : index
      %c0_9 = arith.constant 0 : index
      %10 = vector.load %arg2[%c0_8, %c0_9] : memref<16x128xf32, #tpu.memory_space<vmem>>, vector<16x128xf32>
      %cst_10 = arith.constant dense<0.000000e+00> : vector<16xf32>
      %11 = vector.multi_reduction <add>, %10, %cst_10 [1] : vector<16x128xf32> to vector<16xf32>
      %12 = vector.shape_cast %11 : vector<16xf32> to vector<16x1xf32>
      %cst_11 = arith.constant 3.125000e-02 : f32
      %13 = vector.broadcast %cst_11 : f32 to vector<16x1xf32>
      %14 = arith.mulf %12, %13 : vector<16x1xf32>
      %15 = vector.broadcast %14 : vector<16x1xf32> to vector<16x128xf32>
      %16 = arith.subf %10, %15 : vector<16x128xf32>
      %17 = tpu.iota {dimensions = array<i32: 1>} : vector<16x128xi32>
      %c32_i32 = arith.constant 32 : i32
      %18 = vector.broadcast %c32_i32 : i32 to vector<16x128xi32>
      %19 = arith.cmpi slt, %17, %18 : vector<16x128xi32>
      %cst_12 = arith.constant 0.000000e+00 : f32
      %20 = vector.broadcast %cst_12 : f32 to vector<16x128xf32>
      %21 = arith.select %19, %16, %20 : vector<16x128xi1>, vector<16x128xf32>
      %22 = arith.mulf %21, %21 : vector<16x128xf32>
      %cst_13 = arith.constant dense<0.000000e+00> : vector<16xf32>
      %23 = vector.multi_reduction <add>, %22, %cst_13 [1] : vector<16x128xf32> to vector<16xf32>
      %24 = vector.shape_cast %23 : vector<16xf32> to vector<16x1xf32>
      %cst_14 = arith.constant 3.125000e-02 : f32
      %25 = vector.broadcast %cst_14 : f32 to vector<16x1xf32>
      %26 = arith.mulf %24, %25 : vector<16x1xf32>
      %cst_15 = arith.constant 9.99999974E-6 : f32
      %27 = vector.broadcast %cst_15 : f32 to vector<16x1xf32>
      %28 = arith.addf %26, %27 : vector<16x1xf32>
      %29 = math.rsqrt %28 : vector<16x1xf32>
      %30 = vector.broadcast %29 : vector<16x1xf32> to vector<16x128xf32>
      %31 = arith.mulf %21, %30 : vector<16x128xf32>
      %c0_16 = arith.constant 0 : index
      %c0_17 = arith.constant 0 : index
      %32 = vector.load %arg3[%c0_16, %c0_17] : memref<1x128xf32, #tpu.memory_space<vmem>>, vector<1x128xf32>
      %33 = vector.broadcast %32 : vector<1x128xf32> to vector<16x128xf32>
      %34 = arith.mulf %31, %33 : vector<16x128xf32>
      %c0_18 = arith.constant 0 : index
      %c0_19 = arith.constant 0 : index
      %35 = vector.load %arg4[%c0_18, %c0_19] : memref<1x128xf32, #tpu.memory_space<vmem>>, vector<1x128xf32>
      %36 = vector.broadcast %35 : vector<1x128xf32> to vector<16x128xf32>
      %37 = arith.addf %34, %36 : vector<16x128xf32>
      %38 = arith.truncf %37 : vector<16x128xf32> to vector<16x128xbf16>
      %c0_20 = arith.constant 0 : index
      %c0_21 = arith.constant 0 : index
      %39 = vector.load %arg8[%c0_20, %c0_21] : memref<16x128xbf16, #tpu.memory_space<vmem>>, vector<16x128xbf16>
      tpu.vector_store %arg8[%c0_20, %c0_21], %38 {strides = array<i32>} : memref<16x128xbf16, #tpu.memory_space<vmem>>, vector<16x128xbf16>,
    } else {
    }
    %c0 = arith.constant 0 : index
    %c0_1 = arith.constant 0 : index
    %3 = vector.load %arg8[%c0, %c0_1] : memref<16x128xbf16, #tpu.memory_space<vmem>>, vector<16x128xbf16>
    %c0_2 = arith.constant 0 : index
    %c0_3 = arith.constant 0 : index
    %4 = vector.load %arg5[%c0_2, %c0_3] : memref<128x128xbf16, #tpu.memory_space<vmem>>, vector<128x128xbf16>
    %cst = arith.constant dense<0.000000e+00> : vector<16x128xf32>
    %5 = tpu.matmul %3, %4, %cst {dimension_numbers = #tpu.dot_dimension_numbers<[1], [0], [0], [1], [0, 0, 1, 1], [], []>} : vector<16x128xbf16>, vector<128x128xbf16>, vector<16x128xf32> -> vector<16x128xf32>
    %c0_4 = arith.constant 0 : index
    %c0_5 = arith.constant 0 : index
    %6 = vector.load %arg6[%c0_4, %c0_5] : memref<1x128xf32, #tpu.memory_space<vmem>>, vector<1x128xf32>
    %7 = vector.broadcast %6 : vector<1x128xf32> to vector<16x128xf32>
    %8 = arith.addf %5, %7 : vector<16x128xf32>
    %c0_6 = arith.constant 0 : index
    %c0_7 = arith.constant 0 : index
    %9 = vector.load %arg7[%c0_6, %c0_7] : memref<16x128xf32, #tpu.memory_space<vmem>>, vector<16x128xf32>
    tpu.vector_store %arg7[%c0_6, %c0_7], %8 {strides = array<i32>} : memref<16x128xf32, #tpu.memory_space<vmem>>, vector<16x128xf32>,
    return
  }
  func.func @transform_0(%arg0: i32, %arg1: i32) -> (i32, i32) {
    %c0_i32 = arith.constant 0 : i32
    %c0_i32_0 = arith.constant 0 : i32
    return %arg0, %c0_i32 : i32, i32
  }
  func.func @transform_1(%arg0: i32, %arg1: i32) -> (i32, i32) {
    %c0_i32 = arith.constant 0 : i32
    %c0_i32_0 = arith.constant 0 : i32
    %c0_i32_1 = arith.constant 0 : i32
    return %c0_i32, %c0_i32_0 : i32, i32
  }
  func.func @transform_2(%arg0: i32, %arg1: i32) -> (i32, i32) {
    %c0_i32 = arith.constant 0 : i32
    %c0_i32_0 = arith.constant 0 : i32
    %c0_i32_1 = arith.constant 0 : i32
    return %c0_i32, %c0_i32_0 : i32, i32
  }
  func.func @transform_3(%arg0: i32, %arg1: i32) -> (i32, i32) {
    %c0_i32 = arith.constant 0 : i32
    %c0_i32_0 = arith.constant 0 : i32
    return %c0_i32, %arg1 : i32, i32
  }
  func.func @transform_4(%arg0: i32, %arg1: i32) -> (i32, i32) {
    %c0_i32 = arith.constant 0 : i32
    %c0_i32_0 = arith.constant 0 : i32
    return %c0_i32, %arg1 : i32, i32
  }
  func.func @transform_5(%arg0: i32, %arg1: i32) -> (i32, i32) {
    %c0_i32 = arith.constant 0 : i32
    return %arg0, %arg1 : i32, i32
  }
}

</mosaic_0001>

<bundles_post_ra>
// kernel: prenorm_linear_prepared.1
= control target key start
LH: loop header
LB: loop body
LE: loop exit
PB: predicated region body
PF: predicated region fallthrough
CT: control target
= control target key end

     0   :  { %10 = vsyncpa [#allocation4], 0  ;;  %s313_s18 = smov [#allocation3]   ;;  %s372_s0 = inlined_call_operand.vmem [shape: f32[16,128], index: 0, kind: input, shape index: {}]   ;;  %s373_s1 = inlined_call_operand.vmem [shape: f32[1,128], index: 1, kind: input, shape index: {}]   ;;  %s374_s2 = inlined_call_operand.vmem [shape: f32[1,128], index: 2, kind: input, shape index: {}]   ;;  %s375_s3 = inlined_call_operand.hbm [shape: bf16[128,128], index: 3, kind: input, shape index: {}]   ;;  %s376_s4 = inlined_call_operand.vmem [shape: f32[1,128], index: 4, kind: input, shape index: {}]   ;;  %s377_s5 = inlined_call_operand.vmem [shape: f32[16,128], index: 5, kind: output, shape index: {}]  }
   0x1   :  { %s22_s19 = sshll.u32 %s313_s18, 4  ;;  %s23_s19 = int_to_ptr.vmem [resolvable:$true] %s22_s19 }
   0x2   :  { %s299_s20 = scalar_lea.vmem %s23_s19, 1024  ;;  %p304_p1 = scmp.lt.s32.totalorder %s23_s19, %s23_s19 }
   0x3   :  { %p300_p0 = scmp.ne.s32.totalorder %s23_s19, %s299_s20  ;;  %p305_p2 = scmp.lt.s32.totalorder %s299_s20, %s299_s20 }
   0x5   :  { %p306_p3 = por %p305_p2, %p304_p1 }
   0x7   :  { %p307_p4 = pnand %p306_p3, %p300_p0 }
   0x9   :  { %310 = shalt.err (!%p307_p4)
}
   0xa   :  { %s314_s21 = smov 64   ;;  %s315_s22 = smov 4  }
   0xb   :  { %28 = dma.hbm_to_vmem [thread:$0]  %s375_s3, 1024, %s23_s19, [#allocation4], %s314_s21, %s314_s21, %s315_s22  }
   0xc   :  { %311 = dma.done.wait [#allocation4], 1024  }
   0xd   :  { %312 = vsyncadd [#allocation4], 4294966272  ;;  %v39_v0 = vld [vmem:[%s372_s0] sm:$0xff]  ;;  %v40_v1 = vld [vmem:[%s372_s0 + $0x8] sm:$0xff]  ;;  %v49_v2 = vlaneseq  ;;  %v316_v15 = vmov 0.0   ;;  %vm317_vm1 = vmmov 0  }
   0xe   :  { %41 = vadd.xlane.f32.xlu0 %v39_v0  ;;  %v278_v14 = vld [vmem:[#allocation3 + $0x38] sm:$0xff]   ;;  %253 = vmatprep.subr.bf16.mxu0 %v316_v15  ;;  %v279_v16 = vld [vmem:[#allocation3 + $0x30] sm:$0xff]   ;;  %v280_v17 = vld [vmem:[#allocation3 + $0x28] sm:$0xff]  }
   0xf   :  { %v50_v3 = vand.u32 127, %v49_v2  ;;  %254 = vmatpush3.bf16.msra.mxu0 %v278_v14  ;;  %v281_v18 = vld [vmem:[#allocation3 + $0x20] sm:$0xff]   ;;  %v282_v19 = vld [vmem:[#allocation3 + $0x18] sm:$0xff]   ;;  %v283_v20 = vld [vmem:[#allocation3 + $0x10] sm:$0xff]   ;;  %269 = vmatprep.mubr.msk.bf16.mxu0 %vm317_vm1, %v316_v15 }
  0x10   :  { %255 = vmatprep.subr.bf16.mxu0 %v316_v15  ;;  %v284_v21 = vld [vmem:[#allocation3 + $0x8] sm:$0xff]   ;;  %v285_v22 = vld [vmem:[#allocation3] sm:$0xff]   ;;  %v223_v31 = vld [vmem:[%s373_s1] ss:$0 sm:$0xff] }
  0x11   :  { %vm51_vm0 = vcmp.lt.s32.totalorder %v50_v3, 32  ;;  %v224_v35 = vld [vmem:[%s374_s2] ss:$0 sm:$0xff] }
  0x12   :  { %43 = vadd.xlane.f32.xlu0 %v40_v1  ;;  %v227_v41 = vld [vmem:[%s376_s4] ss:$0 sm:$0xff] }
  0x13   :  { %256 = vmatpush3.bf16.msra.mxu0 %v279_v16 }
  0x14   :  { %257 = vmatprep.subr.bf16.mxu0 %v316_v15 }
  0x17   :  { %258 = vmatpush3.bf16.msra.mxu0 %v280_v17 }
  0x18   :  { %259 = vmatprep.subr.bf16.mxu0 %v316_v15 }
  0x1b   :  { %260 = vmatpush3.bf16.msra.mxu0 %v281_v18 }
  0x1c   :  { %261 = vmatprep.subr.bf16.mxu0 %v316_v15 }
  0x1f   :  { %262 = vmatpush3.bf16.msra.mxu0 %v282_v19 }
  0x20   :  { %263 = vmatprep.subr.bf16.mxu0 %v316_v15 }
  0x23   :  { %264 = vmatpush3.bf16.msra.mxu0 %v283_v20 }
  0x24   :  { %265 = vmatprep.subr.bf16.mxu0 %v316_v15 }
  0x27   :  { %266 = vmatpush3.bf16.msra.mxu0 %v284_v21 }
  0x28   :  { %267 = vmatprep.subr.bf16.mxu0 %v316_v15 }
  0x2b   :  { %268 = vmatpush3.bf16.msra.mxu0 %v285_v22 }
  0x97   :  { %v42_v4 = vpop.xlane.xlu0 %41 }
  0x98   :  { %v45_v5 = vmul.f32 0.03125, %v42_v4 }
  0x9a   :  { %v47_v6 = vsub.f32 %v39_v0, %v45_v5 }
  0x9b   :  { %v44_v7 = vpop.xlane.xlu0 %43 }
  0x9c   :  { %v46_v8 = vmul.f32 0.03125, %v44_v7  ;;  %v52_v9 = vsel %vm51_vm0, %v47_v6, 0.0 }
  0x9d   :  { %v54_v10 = vmul.f32 %v52_v9, %v52_v9 }
  0x9e   :  { %v48_v11 = vsub.f32 %v40_v1, %v46_v8 }
  0x9f   :  { %56 = vadd.xlane.f32.xlu1 %v54_v10 }
  0xa0   :  { %v53_v12 = vsel %vm51_vm0, %v48_v11, 0.0 }
  0xa1   :  { %v55_v13 = vmul.f32 %v53_v12, %v53_v12 }
  0xa3   :  { %58 = vadd.xlane.f32.xlu1 %v55_v13 }
 0x128   :  { %v57_v23 = vpop.xlane.xlu1 %56 }
 0x129   :  { %v60_v24 = vmul.f32 0.03125, %v57_v23 }
 0x12b   :  { %v62_v25 = vadd.f32 1e-05, %v60_v24 }
 0x12c   :  { %v59_v26 = vpop.xlane.xlu1 %58 }
 0x12d   :  { %287 = vrsqrt.f32 %v62_v25  ;;  %v61_v27 = vmul.f32 0.03125, %v59_v26 }
 0x12f   :  { %v63_v28 = vadd.f32 1e-05, %v61_v27 }
 0x131   :  { %289 = vrsqrt.f32 %v63_v28 }
 0x13a   :  { %v288_v29 = vpop.eup %287 }
 0x13b   :  { %v66_v30 = vmul.f32 %v288_v29, %v52_v9 }
 0x13d   :  { %v75_v33 = vmul.f32 %v223_v31, %v66_v30 }
 0x13e   :  { %v290_v32 = vpop.eup %289 }
 0x13f   :  { %v67_v34 = vmul.f32 %v290_v32, %v53_v12  ;;  %v84_v37 = vadd.f32 %v224_v35, %v75_v33 }
 0x141   :  { %v76_v36 = vmul.f32 %v223_v31, %v67_v34 }
 0x143   :  { %v85_v38 = vadd.f32 %v224_v35, %v76_v36 }
 0x145   :  { %v242_v39 = vpack.c.bf16 %v85_v38, %v84_v37 }
 0x147   :  { %243 = vst [vmem:[#allocation2] sm:$0xff] %v242_v39  }
 0x14e   :  { %v286_v40 = vld [vmem:[#allocation2] sm:$0xff]  }
 0x14f   :  { %270 = vmatmul.mubr.bf16.vlgmr.msra.gmra.mxu0 %v286_v40 }
 0x20f   :  { %v209_v42 = vpop.f32.mrf.mxu0 }
 0x210   :  { %v210_v43 = vadd.f32 %v227_v41, %v209_v42 }
 0x211   :  { %v271_v44 = vpop.f32.mrf.mxu0 }
 0x212   :  { %216 = vst [vmem:[%s377_s5] sm:$0xff] %v210_v43 }
 0x213   :  { %v212_v45 = vpop.f32.mrf.mxu0 }
 0x214   :  { %v213_v46 = vadd.f32 %v227_v41, %v212_v45 }
 0x215   :  { %v272_v47 = vpop.f32.mrf.mxu0 }
 0x216   :  { %217 = vst [vmem:[%s377_s5 + $0x8] sm:$0xff] %v213_v46 }
 0x217   :  { %222 = vsyncpa [#allocation4], 1 }

</bundles_post_ra>
